<compile_context>
chip_gen: v6e
topology: v6e:2x2x1
jax: 0.10.0
libtpu: 0.0.40
codegen_flags: <defaults>
</compile_context>

<pallas_src>
import jax
import jax.numpy as jnp
from jax import lax
from jax.experimental import pallas as pl
from jax.experimental.pallas import tpu as pltpu

# ----------------------------- problem sizes --------------------------------
B = 2            # batch
L = 8            # text token length
VOCAB = 64       # synthetic vocab
D_TXT = 32       # text encoder hidden (clip_emb dim)
D_BERT = 32      # sbert hidden
D_EMB = 32       # joint embedding dim
D_HID = 2 * D_EMB
T = 16           # motion sequence length
D_MOT = 8        # motion feature dim
D_SEQ = T * D_MOT          # 128 -> lane-dense motion / recon width

# ------------------- packed weight slab layout ([W_ROWS, 128] f32) ----------
W_LANES = 128
ROW_POOLED = 0                      # [VOCAB, D_TXT]  pre-folded txt_embed @ pool_w
ROW_SBERT = ROW_POOLED + VOCAB      # [VOCAB, D_BERT]
ROW_MENC = ROW_SBERT + VOCAB        # [D_SEQ, D_EMB]  tiled (mean-folded) motion-enc W
ROW_PW1 = ROW_MENC + D_SEQ          # [D_TXT, D_HID]
ROW_PW2 = ROW_PW1 + D_TXT           # [D_HID, D_EMB]
ROW_DECW = ROW_PW2 + D_HID          # [D_EMB, D_SEQ]
ROW_BIAS = ROW_DECW + D_EMB         # 8 rows: pool_b, proj_b1, proj_b2, menc_b, dec_b
W_ROWS = ROW_BIAS + 8               # 392 rows (~200 KB), every block 8-row aligned

# -------------------- packed output slab (one [8, 128] f32 tile) ------------
OUT_ROWS = 8
OUT_LANES = 128
OFF_M = 0                  # rows 0:B, cols  0:32   -> m_emb
OFF_T = D_EMB              # rows 0:B, cols 32:64   -> t_emb
OFF_CLIP = 2 * D_EMB       # rows 0:B, cols 64:96   -> clip_emb
OFF_SIM = 3 * D_EMB        # rows 0:B, cols 96:96+B -> t_similarity
ROW_TREC = B               # rows B:2B              -> t_recon (flattened)
ROW_MREC = 2 * B           # rows 2B:3B             -> m_recon (flattened)

# static layout sanity (would silently break if B / D_EMB grow)
assert 3 * B <= OUT_ROWS and OFF_SIM + B <= OUT_LANES
assert max(D_TXT, D_BERT, D_EMB, D_HID, D_SEQ) <= W_LANES and W_ROWS % 8 == 0

# ----------------------------- cost estimate ---------------------------------
_FLOPS = 2 * B * (VOCAB * D_TXT                    # pooler one-hot gather matmul
                  + D_TXT * D_HID + D_HID * D_EMB  # projector MLP
                  + D_SEQ * D_EMB                  # motion encoder (mean folded)
                  + L * VOCAB                      # masked one-hot counts
                  + VOCAB * D_BERT                 # sbert pooling matmul
                  + D_BERT * B                     # cosine-sim matrix
                  + 2 * D_EMB * D_SEQ)             # both decoder matmuls (merged)
_TRANSCENDENTALS = B * (D_TXT + 1)                 # tanh + rsqrt
_BYTES = 4 * (W_ROWS * W_LANES + B * D_SEQ + OUT_ROWS * OUT_LANES + 2 * B * L)


# ----------------------------- fused Pallas kernel ---------------------------
def _fused_forward_kernel(ids_ref, mask_ref, mot_ref, w_ref, out_ref):
    f32 = jnp.float32
    ids = ids_ref[...]                       # [B, L] int32
    mask = mask_ref[...]                     # [B, L] f32

    # --- frozen text_encoder pooler: clip_emb = tanh(pooled_table[ids[:,0]] + bp)
    # (pooled_table = txt_embed @ pool_w was folded host-side; the gather is an
    #  exact one-hot MXU contraction.)
    id0 = ids[:, 0:1]                                                     # [B, 1]
    onehot0 = (lax.broadcasted_iota(jnp.int32, (B, VOCAB), 1) == id0).astype(f32)
    pooled_tab = w_ref[ROW_POOLED:ROW_POOLED + VOCAB, 0:D_TXT]            # [V, D_TXT]
    pool_b = w_ref[ROW_BIAS + 0:ROW_BIAS + 1, 0:D_TXT]                    # [1, D_TXT]
    clip_emb = jnp.tanh(
        jnp.dot(onehot0, pooled_tab, preferred_element_type=f32) + pool_b)

    # --- trainables['text'] = TextProjectorV1 (2-layer MLP on clip_emb) ---
    w1 = w_ref[ROW_PW1:ROW_PW1 + D_TXT, 0:D_HID]
    b1 = w_ref[ROW_BIAS + 1:ROW_BIAS + 2, 0:D_HID]
    w2 = w_ref[ROW_PW2:ROW_PW2 + D_HID, 0:D_EMB]
    b2 = w_ref[ROW_BIAS + 2:ROW_BIAS + 3, 0:D_EMB]
    h = jnp.maximum(jnp.dot(clip_emb, w1, preferred_element_type=f32) + b1, 0.0)
    t_emb = jnp.dot(h, w2, preferred_element_type=f32) + b2               # [B, D_EMB]

    # --- frozen motion_encoder(motion).loc[:, 0] ---
    # temporal mean folded into the matmul: mot_flat [B, T*D_MOT] @ tile(W/T).
    menc_w = w_ref[ROW_MENC:ROW_MENC + D_SEQ, 0:D_EMB]
    menc_b = w_ref[ROW_BIAS + 3:ROW_BIAS + 4, 0:D_EMB]
    mot_emb = jnp.dot(mot_ref[...], menc_w,
                      preferred_element_type=f32) + menc_b                # [B, D_EMB]

    # --- calc_text_similarity: sbert masked pooling + L2 norm + cosine sim ---
    # token gather + masked sum collapsed into one [B,V]@[V,D] matmul.
    # The masked-mean denominator is dropped: a positive per-row scalar cancels
    # under the L2 normalization, so sim is unchanged.
    onehot = (lax.broadcasted_iota(jnp.int32, (B, L, VOCAB), 2)
              == ids[:, :, None]).astype(f32)                             # [B, L, V]
    counts = jnp.sum(onehot * mask[:, :, None], axis=1)                   # [B, V]
    sbert_tab = w_ref[ROW_SBERT:ROW_SBERT + VOCAB, 0:D_BERT]
    sent = jnp.dot(counts, sbert_tab, preferred_element_type=f32)         # [B, D_BERT]
    sq = jnp.sum(sent * sent, axis=1, keepdims=True)
    sent_n = sent * lax.rsqrt(jnp.maximum(sq, 1e-24))                     # F.normalize
    # sent_n is unit-norm, so cosine_similarity == plain dot (second norm dropped).
    sim = jnp.dot(sent_n, sent_n.T, preferred_element_type=f32)           # [B, B]

    # --- motion_decoder on both embeddings, merged into a single matmul ---
    dec_w = w_ref[ROW_DECW:ROW_DECW + D_EMB, 0:D_SEQ]
    dec_b = w_ref[ROW_BIAS + 4:ROW_BIAS + 5, 0:D_SEQ]
    both = jnp.concatenate([t_emb, mot_emb], axis=0)                      # [2B, D_EMB]
    recon = jnp.dot(both, dec_w, preferred_element_type=f32) + dec_b      # [2B, 128]

    # --- assemble the whole output slab in registers; ONE unmasked full-tile store
    sim_blk = jnp.concatenate([sim, jnp.zeros((B, D_EMB - B), f32)], axis=1)   # [B, 32]
    row0 = jnp.concatenate([mot_emb, t_emb, clip_emb, sim_blk], axis=1)        # [B, 128]
    slab = jnp.concatenate(
        [row0, recon, jnp.zeros((OUT_ROWS - 3 * B, OUT_LANES), f32)], axis=0)  # [8, 128]
    out_ref[...] = slab


def _fused_forward_call(params, motion, text_ids, text_mask):
    mot_flat = motion.reshape(B, D_SEQ)                                   # [B, 128] lane-dense
    # No grid / no BlockSpecs: whole arrays are placed in VMEM once (single
    # buffer), so there are exactly 4 input DMAs (ids, mask, motion, weight slab)
    # and 1 output DMA.
    return pl.pallas_call(
        _fused_forward_kernel,
        out_shape=jax.ShapeDtypeStruct((OUT_ROWS, OUT_LANES), jnp.float32),
        cost_estimate=pl.CostEstimate(
            flops=_FLOPS, transcendentals=_TRANSCENDENTALS, bytes_accessed=_BYTES),
    )(text_ids.astype(jnp.int32),
      text_mask.astype(jnp.float32),
      mot_flat,
      params["wslab"])


# ----------------------------- parameter init -------------------------------
def _pack_weights(p):
    """Concatenate all weights/biases into one 128-lane f32 slab (one DMA)."""
    slab = jnp.zeros((W_ROWS, W_LANES), jnp.float32)

    def put(s, r0, arr):
        r, c = arr.shape
        return s.at[r0:r0 + r, 0:c].set(arr.astype(jnp.float32))

    pooled = p["txt_embed"] @ p["pool_w"]                 # pre-folded pooler table
    slab = put(slab, ROW_POOLED, pooled)
    slab = put(slab, ROW_SBERT, p["sbert_embed"])
    slab = put(slab, ROW_MENC, p["menc_w_tiled"])
    slab = put(slab, ROW_PW1, p["proj_w1"])
    slab = put(slab, ROW_PW2, p["proj_w2"])
    slab = put(slab, ROW_DECW, p["dec_w"])
    slab = put(slab, ROW_BIAS + 0, p["pool_b"])
    slab = put(slab, ROW_BIAS + 1, p["proj_b1"])
    slab = put(slab, ROW_BIAS + 2, p["proj_b2"])
    slab = put(slab, ROW_BIAS + 3, p["menc_b"])
    slab = put(slab, ROW_BIAS + 4, p["dec_b"])
    return slab


def init_params(key):
    ks = jax.random.split(key, 8)
    s = 0.02
    menc_w = s * jax.random.normal(ks[4], (D_MOT, D_EMB), jnp.float32)
    p = {
        # frozen synthetic "text_encoder": token embedding + tanh pooler (clip_emb)
        "txt_embed": s * jax.random.normal(ks[0], (VOCAB, D_TXT), jnp.float32),
        "pool_w": s * jax.random.normal(ks[1], (D_TXT, D_TXT), jnp.float32),
        "pool_b": jnp.zeros((1, D_TXT), jnp.float32),
        # trainables['text'] = TextProjectorV1 (MLP on clip_emb)
        "proj_w1": s * jax.random.normal(ks[2], (D_TXT, D_HID), jnp.float32),
        "proj_b1": jnp.zeros((1, D_HID), jnp.float32),
        "proj_w2": s * jax.random.normal(ks[3], (D_HID, D_EMB), jnp.float32),
        "proj_b2": jnp.zeros((1, D_EMB), jnp.float32),
        # frozen synthetic motion_encoder (.loc[:, 0]); tiled weight folds mean(axis=1)
        "menc_w": menc_w,
        "menc_w_tiled": jnp.tile(menc_w / T, (T, 1)),     # [T*D_MOT, D_EMB]
        "menc_b": jnp.zeros((1, D_EMB), jnp.float32),
        # frozen synthetic sbert token embedding table
        "sbert_embed": s * jax.random.normal(ks[5], (VOCAB, D_BERT), jnp.float32),
        # frozen synthetic motion_decoder: emb -> full motion sequence
        "dec_w": s * jax.random.normal(ks[6], (D_EMB, D_SEQ), jnp.float32),
        "dec_b": jnp.zeros((1, D_SEQ), jnp.float32),
    }
    p["wslab"] = _pack_weights(p)                         # [392, 128] f32 — one DMA
    return p


# ----------------------------- forward pass ----------------------------------
def _forward_impl(params, motion, text_ids, text_mask, decode=True):
    slab = _fused_forward_call(params, motion, text_ids, text_mask)
    output = {
        "m_emb": slab[0:B, OFF_M:OFF_M + D_EMB],
        "t_emb": slab[0:B, OFF_T:OFF_T + D_EMB],
        "clip_emb": slab[0:B, OFF_CLIP:OFF_CLIP + D_TXT],
        "t_similarity": slab[0:B, OFF_SIM:OFF_SIM + B],
    }
    if decode:
        output["t_recon"] = slab[ROW_TREC:ROW_TREC + B, :].reshape(B, T, D_MOT)
        output["m_recon"] = slab[ROW_MREC:ROW_MREC + B, :].reshape(B, T, D_MOT)
    return output


forward = jax.jit(_forward_impl, static_argnames=("decode",))


# ----------------------------- pure-JAX reference ----------------------------
def reference_forward(params, motion, text_ids, text_mask, decode=True):
    tok0 = params["txt_embed"][text_ids[:, 0]]
    clip_emb = jnp.tanh(tok0 @ params["pool_w"] + params["pool_b"])
    h = jnp.maximum(clip_emb @ params["proj_w1"] + params["proj_b1"], 0.0)
    t_emb = h @ params["proj_w2"] + params["proj_b2"]
    mot_emb = jnp.mean(motion, axis=1) @ params["menc_w"] + params["menc_b"]
    tok = params["sbert_embed"][text_ids]                 # [B, L, D_BERT]
    m = text_mask[:, :, None].astype(jnp.float32)
    sent = jnp.sum(tok * m, axis=1) / jnp.maximum(jnp.sum(m, axis=1), 1e-9)
    nrm = jnp.sqrt(jnp.sum(sent * sent, axis=1, keepdims=True))
    sent_n = sent / jnp.maximum(nrm, 1e-12)
    sim = sent_n @ sent_n.T
    out = {"m_emb": mot_emb, "t_emb": t_emb, "clip_emb": clip_emb, "t_similarity": sim}
    if decode:
        out["t_recon"] = (t_emb @ params["dec_w"] + params["dec_b"]).reshape(B, T, D_MOT)
        out["m_recon"] = (mot_emb @ params["dec_w"] + params["dec_b"]).reshape(B, T, D_MOT)
    return out


# ----------------------------- driver ----------------------------------------
if __name__ == "__main__":
    key = jax.random.PRNGKey(0)
    k_par, k_mot, k_ids = jax.random.split(key, 3)

    params = init_params(k_par)

    motion = jax.random.normal(k_mot, (B, T, D_MOT), jnp.float32)
    text_ids = jax.random.randint(k_ids, (B, L), 0, VOCAB)
    # deterministic attention mask: first row fully valid, second row padded at tail
    text_mask = jnp.array([[1] * L, [1] * (L - 3) + [0] * 3], dtype=jnp.float32)

    out = forward(params, motion, text_ids, text_mask, decode=True)
    out = jax.tree_util.tree_map(jax.block_until_ready, out)

    # shape checks
    assert out["m_emb"].shape == (B, D_EMB)
    assert out["t_emb"].shape == (B, D_EMB)
    assert out["clip_emb"].shape == (B, D_TXT)
    assert out["t_similarity"].shape == (B, B)
    assert out["t_recon"].shape == (B, T, D_MOT)
    assert out["m_recon"].shape == (B, T, D_MOT)

    # numerical check against pure-JAX reference
    ref = reference_forward(params, motion, text_ids, text_mask, decode=True)
    for k in ref:
        assert bool(jnp.allclose(out[k], ref[k], atol=1e-5, rtol=1e-5)), k
    # cosine-similarity diagonal must be ~1 (unit-normalized embeddings)
    assert bool(jnp.allclose(jnp.diagonal(out["t_similarity"]), 1.0, atol=1e-3))

    print("KERNEL_OK")
</pallas_src>

<mosaic_0001>
module attributes {stable_mosaic.version = 11 : i64} {
  func.func @_fused_forward_kernel(%arg0: memref<2x8xi32, #tpu.memory_space<vmem>>, %arg1: memref<2x8xf32, #tpu.memory_space<vmem>>, %arg2: memref<2x128xf32, #tpu.memory_space<vmem>>, %arg3: memref<392x128xf32, #tpu.memory_space<vmem>>, %arg4: memref<8x128xf32, #tpu.memory_space<vmem>>) attributes {dimension_semantics = [], scalar_prefetch = 0 : i64, scratch_operands = 0 : i64, tpu.core_type = #tpu.core_type<tc>} {
    %c0 = arith.constant 0 : index
    %c0_0 = arith.constant 0 : index
    %0 = vector.load %arg0[%c0, %c0_0] : memref<2x8xi32, #tpu.memory_space<vmem>>, vector<2x8xi32>
    %c0_1 = arith.constant 0 : index
    %c0_2 = arith.constant 0 : index
    %1 = vector.load %arg1[%c0_1, %c0_2] : memref<2x8xf32, #tpu.memory_space<vmem>>, vector<2x8xf32>
    %2 = vector.extract_strided_slice %0 {offsets = [0, 0], sizes = [2, 1], strides = [1, 1]} : vector<2x8xi32> to vector<2x1xi32>
    %3 = tpu.iota {dimensions = array<i32: 1>} : vector<2x64xi32>
    %4 = vector.broadcast %2 : vector<2x1xi32> to vector<2x64xi32>
    %5 = arith.cmpi eq, %3, %4 : vector<2x64xi32>
    %6 = arith.extui %5 : vector<2x64xi1> to vector<2x64xi32>
    %7 = arith.sitofp %6 : vector<2x64xi32> to vector<2x64xf32>
    %c0_3 = arith.constant 0 : index
    %c0_4 = arith.constant 0 : index
    %8 = vector.load %arg3[%c0_3, %c0_4] : memref<392x128xf32, #tpu.memory_space<vmem>>, vector<64x32xf32>
    %c384 = arith.constant 384 : index
    %c0_5 = arith.constant 0 : index
    %9 = vector.load %arg3[%c384, %c0_5] : memref<392x128xf32, #tpu.memory_space<vmem>>, vector<1x32xf32>
    %cst = arith.constant dense<0.000000e+00> : vector<2x32xf32>
    %10 = tpu.matmul %7, %8, %cst {dimension_numbers = #tpu.dot_dimension_numbers<[1], [0], [0], [1], [0, 0, 1, 1], [], []>} : vector<2x64xf32>, vector<64x32xf32>, vector<2x32xf32> -> vector<2x32xf32>
    %11 = vector.broadcast %9 : vector<1x32xf32> to vector<2x32xf32>
    %12 = arith.addf %10, %11 : vector<2x32xf32>
    %13 = math.tanh %12 : vector<2x32xf32>
    %c256 = arith.constant 256 : index
    %c0_6 = arith.constant 0 : index
    %14 = vector.load %arg3[%c256, %c0_6] : memref<392x128xf32, #tpu.memory_space<vmem>>, vector<32x64xf32>
    %c385 = arith.constant 385 : index
    %c0_7 = arith.constant 0 : index
    %15 = vector.load %arg3[%c385, %c0_7] : memref<392x128xf32, #tpu.memory_space<vmem>>, vector<1x64xf32>
    %c288 = arith.constant 288 : index
    %c0_8 = arith.constant 0 : index
    %16 = vector.load %arg3[%c288, %c0_8] : memref<392x128xf32, #tpu.memory_space<vmem>>, vector<64x32xf32>
    %c386 = arith.constant 386 : index
    %c0_9 = arith.constant 0 : index
    %17 = vector.load %arg3[%c386, %c0_9] : memref<392x128xf32, #tpu.memory_space<vmem>>, vector<1x32xf32>
    %cst_10 = arith.constant dense<0.000000e+00> : vector<2x64xf32>
    %18 = tpu.matmul %13, %14, %cst_10 {dimension_numbers = #tpu.dot_dimension_numbers<[1], [0], [0], [1], [0, 0, 1, 1], [], []>} : vector<2x32xf32>, vector<32x64xf32>, vector<2x64xf32> -> vector<2x64xf32>
    %19 = vector.broadcast %15 : vector<1x64xf32> to vector<2x64xf32>
    %20 = arith.addf %18, %19 : vector<2x64xf32>
    %cst_11 = arith.constant 0.000000e+00 : f32
    %21 = vector.broadcast %cst_11 : f32 to vector<2x64xf32>
    %22 = arith.maximumf %20, %21 : vector<2x64xf32>
    %cst_12 = arith.constant dense<0.000000e+00> : vector<2x32xf32>
    %23 = tpu.matmul %22, %16, %cst_12 {dimension_numbers = #tpu.dot_dimension_numbers<[1], [0], [0], [1], [0, 0, 1, 1], [], []>} : vector<2x64xf32>, vector<64x32xf32>, vector<2x32xf32> -> vector<2x32xf32>
    %24 = vector.broadcast %17 : vector<1x32xf32> to vector<2x32xf32>
    %25 = arith.addf %23, %24 : vector<2x32xf32>
    %c128 = arith.constant 128 : index
    %c0_13 = arith.constant 0 : index
    %26 = vector.load %arg3[%c128, %c0_13] : memref<392x128xf32, #tpu.memory_space<vmem>>, vector<128x32xf32>
    %c387 = arith.constant 387 : index
    %c0_14 = arith.constant 0 : index
    %27 = vector.load %arg3[%c387, %c0_14] : memref<392x128xf32, #tpu.memory_space<vmem>>, vector<1x32xf32>
    %c0_15 = arith.constant 0 : index
    %c0_16 = arith.constant 0 : index
    %28 = vector.load %arg2[%c0_15, %c0_16] : memref<2x128xf32, #tpu.memory_space<vmem>>, vector<2x128xf32>
    %cst_17 = arith.constant dense<0.000000e+00> : vector<2x32xf32>
    %29 = tpu.matmul %28, %26, %cst_17 {dimension_numbers = #tpu.dot_dimension_numbers<[1], [0], [0], [1], [0, 0, 1, 1], [], []>} : vector<2x128xf32>, vector<128x32xf32>, vector<2x32xf32> -> vector<2x32xf32>
    %30 = vector.broadcast %27 : vector<1x32xf32> to vector<2x32xf32>
    %31 = arith.addf %29, %30 : vector<2x32xf32>
    %32 = tpu.iota {dimensions = array<i32: 2>} : vector<2x8x64xi32>
    %33 = vector.shape_cast %0 : vector<2x8xi32> to vector<2x8x1xi32>
    %34 = vector.broadcast %33 : vector<2x8x1xi32> to vector<2x8x64xi32>
    %35 = arith.cmpi eq, %32, %34 : vector<2x8x64xi32>
    %36 = arith.extui %35 : vector<2x8x64xi1> to vector<2x8x64xi32>
    %37 = arith.sitofp %36 : vector<2x8x64xi32> to vector<2x8x64xf32>
    %38 = vector.shape_cast %1 : vector<2x8xf32> to vector<2x8x1xf32>
    %39 = vector.broadcast %38 : vector<2x8x1xf32> to vector<2x8x64xf32>
    %40 = arith.mulf %37, %39 : vector<2x8x64xf32>
    %cst_18 = arith.constant dense<0.000000e+00> : vector<2x64xf32>
    %41 = vector.multi_reduction <add>, %40, %cst_18 [1] : vector<2x8x64xf32> to vector<2x64xf32>
    %c64 = arith.constant 64 : index
    %c0_19 = arith.constant 0 : index
    %42 = vector.load %arg3[%c64, %c0_19] : memref<392x128xf32, #tpu.memory_space<vmem>>, vector<64x32xf32>
    %cst_20 = arith.constant dense<0.000000e+00> : vector<2x32xf32>
    %43 = tpu.matmul %41, %42, %cst_20 {dimension_numbers = #tpu.dot_dimension_numbers<[1], [0], [0], [1], [0, 0, 1, 1], [], []>} : vector<2x64xf32>, vector<64x32xf32>, vector<2x32xf32> -> vector<2x32xf32>
    %44 = arith.mulf %43, %43 : vector<2x32xf32>
    %cst_21 = arith.constant dense<0.000000e+00> : vector<2xf32>
    %45 = vector.multi_reduction <add>, %44, %cst_21 [1] : vector<2x32xf32> to vector<2xf32>
    %46 = vector.shape_cast %45 : vector<2xf32> to vector<2x1xf32>
    %cst_22 = arith.constant 1.000000e-24 : f32
    %47 = vector.broadcast %cst_22 : f32 to vector<2x1xf32>
    %48 = arith.maximumf %46, %47 : vector<2x1xf32>
    %49 = math.rsqrt %48 : vector<2x1xf32>
    %50 = vector.broadcast %49 : vector<2x1xf32> to vector<2x32xf32>
    %51 = arith.mulf %43, %50 : vector<2x32xf32>
    %52 = tpu.transpose %51, [1, 0] : vector<2x32xf32> -> vector<32x2xf32>
    %cst_23 = arith.constant dense<0.000000e+00> : vector<2x2xf32>
    %53 = tpu.matmul %51, %52, %cst_23 {dimension_numbers = #tpu.dot_dimension_numbers<[1], [0], [0], [1], [0, 0, 1, 1], [], []>} : vector<2x32xf32>, vector<32x2xf32>, vector<2x2xf32> -> vector<2x2xf32>
    %c352 = arith.constant 352 : index
    %c0_24 = arith.constant 0 : index
    %54 = vector.load %arg3[%c352, %c0_24] : memref<392x128xf32, #tpu.memory_space<vmem>>, vector<32x128xf32>
    %c388 = arith.constant 388 : index
    %c0_25 = arith.constant 0 : index
    %55 = vector.load %arg3[%c388, %c0_25] : memref<392x128xf32, #tpu.memory_space<vmem>>, vector<1x128xf32>
    %56 = tpu.concatenate %25, %31 in 0 : vector<2x32xf32>, vector<2x32xf32> -> vector<4x32xf32>
    %cst_26 = arith.constant dense<0.000000e+00> : vector<4x128xf32>
    %57 = tpu.matmul %56, %54, %cst_26 {dimension_numbers = #tpu.dot_dimension_numbers<[1], [0], [0], [1], [0, 0, 1, 1], [], []>} : vector<4x32xf32>, vector<32x128xf32>, vector<4x128xf32> -> vector<4x128xf32>
    %58 = vector.broadcast %55 : vector<1x128xf32> to vector<4x128xf32>
    %59 = arith.addf %57, %58 : vector<4x128xf32>
    %cst_27 = arith.constant 0.000000e+00 : f32
    %60 = vector.broadcast %cst_27 : f32 to vector<2x30xf32>
    %61 = tpu.concatenate %53, %60 in 1 : vector<2x2xf32>, vector<2x30xf32> -> vector<2x32xf32>
    %62 = tpu.concatenate %31, %25, %13, %61 in 1 : vector<2x32xf32>, vector<2x32xf32>, vector<2x32xf32>, vector<2x32xf32> -> vector<2x128xf32>
    %cst_28 = arith.constant 0.000000e+00 : f32
    %63 = vector.broadcast %cst_28 : f32 to vector<2x128xf32>
    %64 = tpu.concatenate %62, %59, %63 in 0 : vector<2x128xf32>, vector<4x128xf32>, vector<2x128xf32> -> vector<8x128xf32>
    %c0_29 = arith.constant 0 : index
    %c0_30 = arith.constant 0 : index
    %65 = vector.load %arg4[%c0_29, %c0_30] : memref<8x128xf32, #tpu.memory_space<vmem>>, vector<8x128xf32>
    tpu.vector_store %arg4[%c0_29, %c0_30], %64 {strides = array<i32>} : memref<8x128xf32, #tpu.memory_space<vmem>>, vector<8x128xf32>,
    return
  }
}

</mosaic_0001>

<bundles_post_ra>
// kernel: _forward_impl.1
= control target key start
LH: loop header
LB: loop body
LE: loop exit
PB: predicated region body
PF: predicated region fallthrough
CT: control target
= control target key end

     0   :  { %9 = vsyncpa [#allocation3], 0  ;;  %s948_s15 = smov [#allocation2]   ;;  %s1085_s0 = inlined_call_operand.vmem [shape: s32[2,8], index: 0, kind: input, shape index: {}]   ;;  %s1086_s1 = inlined_call_operand.vmem [shape: f32[2,8], index: 1, kind: input, shape index: {}]   ;;  %s1087_s2 = inlined_call_operand.vmem [shape: f32[2,128], index: 2, kind: input, shape index: {}]   ;;  %s1088_s3 = inlined_call_operand.hbm [shape: f32[392,128], index: 3, kind: input, shape index: {}]   ;;  %s1089_s4 = inlined_call_operand.vmem [shape: f32[8,128], index: 4, kind: output, shape index: {}]  }
   0x1   :  { %s21_s16 = sshll.u32 %s948_s15, 4  ;;  %s22_s16 = int_to_ptr.vmem [resolvable:$true] %s21_s16 }
   0x2   :  { %s934_s17 = scalar_lea.vmem %s22_s16, 6272  ;;  %p939_p1 = scmp.lt.s32.totalorder %s22_s16, %s22_s16 }
   0x3   :  { %p935_p0 = scmp.ne.s32.totalorder %s22_s16, %s934_s17  ;;  %p940_p2 = scmp.lt.s32.totalorder %s934_s17, %s934_s17 }
   0x5   :  { %p941_p3 = por %p940_p2, %p939_p1 }
   0x7   :  { %p942_p4 = pnand %p941_p3, %p935_p0 }
   0x9   :  { %945 = shalt.err (!%p942_p4)
}
   0xa   :  { %s949_s18 = smov 128   ;;  %s950_s19 = smov 8  }
   0xb   :  { %27 = dma.hbm_to_vmem [thread:$0]  %s1088_s3, 6272, %s22_s16, [#allocation3], %s949_s18, %s949_s18, %s950_s19  }
   0xc   :  { %946 = dma.done.wait [#allocation3], 6272  }
   0xd   :  { %947 = vsyncadd [#allocation3], 4294961024  ;;  %v951_v0 = vmov 0   ;;  %v952_v1 = vmov 0.0   ;;  %vm953_vm0 = vmmov 0   ;;  %v48_v3 = vld [vmem:[#allocation2 + $0x38] sm:$0xff]  ;;  %v33_v11 = vlaneseq }
   0xe   :  { %921 = vset.pattern.permute.xlu0 %v951_v0  ;;  %793 = vmatprep.subr.mxu0 %v952_v1  ;;  %v31_v2 = vld [vmem:[%s1085_s0] sm:$0x3]  ;;  %v47_v4 = vld [vmem:[#allocation2 + $0x30] sm:$0xff]  ;;  %v46_v5 = vld [vmem:[#allocation2 + $0x28] sm:$0xff]  ;;  %vm54_vm1 = vcmask 523264   ;;  %vm147_vm3 = vcmask 261120  }
   0xf   :  { %812 = vmatprep.subr.mxu1 %v952_v1  ;;  %809 = vmatprep.mubr.msk.f32.mxu0 %vm953_vm0, %v952_v1  ;;  %v45_v6 = vld [vmem:[#allocation2 + $0x20] sm:$0xff]  ;;  %v44_v7 = vld [vmem:[#allocation2 + $0x18] sm:$0xff]  ;;  %v43_v8 = vld [vmem:[#allocation2 + $0x10] sm:$0xff]  ;;  %v1002_v12 = vand.u32 127, %v33_v11  ;;  %v392_v19 = vshrl.u32 %v33_v11, 7  ;;  %vm451_vm6 = vcmask 1041409  }
  0x10   :  { %820 = vmatprep.mubr.msk.f32.mxu1 %vm953_vm0, %v952_v1  ;;  %36 = vperm.xlu0 %921, %v31_v2   ;;  %v42_v9 = vld [vmem:[#allocation2 + $0x8] sm:$0xff]  ;;  %v41_v10 = vld [vmem:[#allocation2] sm:$0xff]  ;;  %v132_v15 = vld [vmem:[#allocation2 + $0x118] sm:$0xff]  ;;  %s955_s25 = smov 64   ;;  %vm526_vm7 = vcmask 254976   ;;  %vm614_vm8 = vcmask 1041408  }
  0x11   :  { %794 = vmatpush3.msra.mxu0 %v48_v3  ;;  %v131_v16 = vld [vmem:[#allocation2 + $0x110] sm:$0xff]  ;;  %813 = vmatpush3.msra.mxu1 %v132_v15  ;;  %v130_v17 = vld [vmem:[#allocation2 + $0x108] sm:$0xff]  ;;  %v129_v18 = vld [vmem:[#allocation2 + $0x100] sm:$0xff]  ;;  %v400_v22 = vsub.s32 1, %v392_v19  ;;  %v393_v23 = vsub.s32 0, %v392_v19  ;;  %vm693_vm9 = vcmask 15360  }
  0x12   :  { %795 = vmatprep.subr.mxu0 %v952_v1  ;;  %814 = vmatprep.subr.mxu1 %v952_v1  ;;  %v314_v20 = vld [vmem:[#allocation2 + $0xf8] sm:$0xff]  ;;  %v313_v21 = vld [vmem:[#allocation2 + $0xf0] sm:$0xff]  ;;  %v312_v24 = vld [vmem:[#allocation2 + $0xe8] sm:$0xff]  ;;  %s956_s26 = smov 96   ;;  %vm708_vm10 = vcmask 785408   ;;  %vm714_vm11 = vcmask 1045504  }
  0x13   :  { %796 = vmatpush3.msra.mxu0 %v47_v4  ;;  %815 = vmatpush3.msra.mxu1 %v131_v16  ;;  %v32_v25 = vld [vmem:[%s1086_s1] sm:$0x3]  ;;  %v401_v26 = vrot.slane %v31_v2, %v400_v22  ;;  %v394_v27 = vrot.slane %v31_v2, %v393_v23  ;;  %v310_v31 = vld [vmem:[#allocation2 + $0xd8] sm:$0xff]  ;;  %v309_v32 = vld [vmem:[#allocation2 + $0xd0] sm:$0xff] }
  0x14   :  { %797 = vmatprep.subr.mxu0 %v952_v1  ;;  %816 = vmatprep.subr.mxu1 %v952_v1  ;;  %v311_v28 = vld [vmem:[#allocation2 + $0xe0] sm:$0xff]  ;;  %v414_v29 = vrot.slane %v32_v25, %v393_v23  ;;  %v421_v30 = vrot.slane %v32_v25, %v400_v22  ;;  %v308_v33 = vld [vmem:[#allocation2 + $0xc8] sm:$0xff]  ;;  %v306_v35 = vld [vmem:[#allocation2 + $0xb8] sm:$0xff] }
  0x15   :  { %798 = vmatpush3.msra.mxu0 %v46_v5  ;;  %817 = vmatpush3.msra.mxu1 %v130_v17  ;;  %v307_v34 = vld [vmem:[#allocation2 + $0xc0] sm:$0xff]  ;;  %v305_v36 = vld [vmem:[#allocation2 + $0xb0] sm:$0xff]  ;;  %v304_v37 = vld [vmem:[#allocation2 + $0xa8] sm:$0xff] }
  0x16   :  { %799 = vmatprep.subr.mxu0 %v952_v1  ;;  %818 = vmatprep.subr.mxu1 %v952_v1  ;;  %v303_v38 = vld [vmem:[#allocation2 + $0xa0] sm:$0xff]  ;;  %v302_v39 = vld [vmem:[#allocation2 + $0x98] sm:$0xff]  ;;  %v301_v40 = vld [vmem:[#allocation2 + $0x90] sm:$0xff] }
  0x17   :  { %800 = vmatpush3.msra.mxu0 %v45_v6  ;;  %819 = vmatpush3.msra.mxu1 %v129_v18  ;;  %v723_v41 = vld [vmem:[#allocation2 + $0x180] ss:$0 sm:$0xff]  ;;  %v141_v45 = vld [vmem:[#allocation2 + $0x158] sm:$0xff]  ;;  %v140_v47 = vld [vmem:[#allocation2 + $0x150] sm:$0xff] }
  0x18   :  { %801 = vmatprep.subr.mxu0 %v952_v1  ;;  %823 = vmatprep.subr.mxu1 %v952_v1  ;;  %v139_v48 = vld [vmem:[#allocation2 + $0x148] sm:$0xff]  ;;  %v138_v49 = vld [vmem:[#allocation2 + $0x140] sm:$0xff]  ;;  %v137_v50 = vld [vmem:[#allocation2 + $0x138] sm:$0xff] }
  0x19   :  { %802 = vmatpush3.msra.mxu0 %v44_v7  ;;  %403 = vbcast.lane.b32.xlu1 %v401_v26, 256  ;;  %v136_v51 = vld [vmem:[#allocation2 + $0x130] sm:$0xff]  ;;  %v300_v52 = vld [vmem:[#allocation2 + $0x88] sm:$0xff]  ;;  %v299_v54 = vld [vmem:[#allocation2 + $0x80] sm:$0xff] }
  0x1a   :  { %803 = vmatprep.subr.mxu0 %v952_v1  ;;  %396 = vbcast.lane.b32.xlu0 %v394_v27, 256  ;;  %v135_v53 = vld [vmem:[#allocation2 + $0x128] sm:$0xff]  ;;  %v134_v55 = vld [vmem:[#allocation2 + $0x120] sm:$0xff]  ;;  %v447_v16 = vld [vmem:[#allocation2 + $0x70] sm:$0xff] }
  0x1b   :  { %804 = vmatpush3.msra.mxu0 %v43_v8  ;;  %v316_v56 = vld [vmem:[%s1087_s2] sm:$0x3]  ;;  %v446_v17 = vld [vmem:[#allocation2 + $0x68] sm:$0xff]  ;;  %s954_s2 = smov 32  }
  0x1c   :  { %805 = vmatprep.subr.mxu0 %v952_v1  ;;  %v725_v6 = vld [vmem:[#allocation2 + $0x181] ss:$0 sm:$0xff]  ;;  %v442_v25 = vld [vmem:[#allocation2 + $0x48] sm:$0xff] }
  0x1d   :  { %806 = vmatpush3.msra.mxu0 %v42_v9  ;;  %416 = vbcast.lane.b32.xlu1 %v414_v29, 256 }
  0x1e   :  { %807 = vmatprep.subr.mxu0 %v952_v1  ;;  %423 = vbcast.lane.b32.xlu0 %v421_v30, 256 }
  0x1f   :  { %808 = vmatpush3.msra.mxu0 %v41_v10 }
  0x20   :  { %842 = vmatprep.subr.mxu0 %v952_v1 }
  0x8b   :  { %v37_v13 = vpop.permute.xlu0 %36  ;;  %v404_v57 = vpop.permute.xlu1 %403 }
  0x8c   :  { %vm38_vm2 = vcmp.eq.s32.totalorder %v1002_v12, %v37_v13  ;;  %vm406_vm4 = vcmp.eq.s32.totalorder %v1002_v12, %v404_v57  ;;  %v448_v13 = vld [vmem:[#allocation2 + $0x78] sm:$0xff] }
  0x8d   :  { %v722_v14 = vsel %vm38_vm2, 1.0, %v952_v1  ;;  %v731_v61 = vsel %vm406_vm4, 1.0, %v952_v1 }
  0x8e   :  { %810 = vmatmul.mubr.msk.f32.vlgmr.msra.gmra.mxu0 %vm54_vm1, %v722_v14 }
  0x8f   :  { %874 = vmatprep.mubr.msk.f32.mxu0 %vm953_vm0, %v952_v1  ;;  %843 = vmatpush3.msra.mxu0 %v314_v20  ;;  %v397_v58 = vpop.permute.xlu0 %396  ;;  %v417_v59 = vpop.permute.xlu1 %416  ;;  %v445_v20 = vld [vmem:[#allocation2 + $0x60] sm:$0xff] }
  0x90   :  { %844 = vmatprep.subr.mxu0 %v952_v1  ;;  %vm405_vm5 = vcmp.eq.s32.totalorder %v1002_v12, %v397_v58  ;;  %v735_v58 = vld [vmem:[#allocation2 + $0x184] ss:$0 sm:$0xff] }
  0x91   :  { %845 = vmatpush3.msra.mxu0 %v313_v21  ;;  %v730_v60 = vsel %vm405_vm5, 1.0, %v952_v1  ;;  %v444_v21 = vld [vmem:[#allocation2 + $0x58] sm:$0xff] }
  0x92   :  { %846 = vmatprep.subr.mxu0 %v952_v1  ;;  %v425_v63 = vmul.f32 %v730_v60, %v417_v59 }
  0x93   :  { %847 = vmatpush3.msra.mxu0 %v312_v24  ;;  %v424_v62 = vpop.permute.xlu0 %423  ;;  %v443_v24 = vld [vmem:[#allocation2 + $0x50] sm:$0xff] }
  0x94   :  { %848 = vmatprep.subr.mxu0 %v952_v1  ;;  %v426_v0 = vmul.f32 %v731_v61, %v424_v62  ;;  %v427_v2 = vsel %vm54_vm1, %v425_v63, 0.0 }
  0x95   :  { %849 = vmatpush3.msra.mxu0 %v311_v28  ;;  %v428_v4 = vrot.slane %v427_v2, 4  ;;  %v441_v28 = vld [vmem:[#allocation2 + $0x40] sm:$0xff] }
  0x96   :  { %850 = vmatprep.subr.mxu0 %v952_v1  ;;  %v434_v3 = vsel %vm54_vm1, %v426_v0, 0.0 }
  0x97   :  { %851 = vmatpush3.msra.mxu0 %v310_v31  ;;  %v435_v5 = vrot.slane %v434_v3, 4  ;;  %v429_v7 = vadd.f32 %v428_v4, %v427_v2 }
  0x98   :  { %852 = vmatprep.subr.mxu0 %v952_v1 }
  0x99   :  { %853 = vmatpush3.msra.mxu0 %v309_v32  ;;  %v436_v8 = vadd.f32 %v435_v5, %v434_v3  ;;  %v430_v14 = vrot.slane %v429_v7, 2  ;;  %v727_v32 = vld [vmem:[#allocation2 + $0x182] ss:$0 sm:$0xff] }
  0x9a   :  { %854 = vmatprep.subr.mxu0 %v952_v1 }
  0x9b   :  { %855 = vmatpush3.msra.mxu0 %v308_v33  ;;  %v437_v15 = vrot.slane %v436_v8, 2  ;;  %v431_v18 = vadd.f32 %v430_v14, %v429_v7 }
  0x9c   :  { %856 = vmatprep.subr.mxu0 %v952_v1 }
  0x9d   :  { %857 = vmatpush3.msra.mxu0 %v307_v34  ;;  %v438_v19 = vadd.f32 %v437_v15, %v436_v8  ;;  %v432_v22 = vrot.slane %v431_v18, 1 }
  0x9e   :  { %858 = vmatprep.subr.mxu0 %v952_v1 }
  0x9f   :  { %859 = vmatpush3.msra.mxu0 %v306_v35  ;;  %v439_v23 = vrot.slane %v438_v19, 1  ;;  %v433_v26 = vadd.f32 %v432_v22, %v431_v18 }
  0xa0   :  { %860 = vmatprep.subr.mxu0 %v952_v1 }
  0xa1   :  { %861 = vmatpush3.msra.mxu0 %v305_v36  ;;  %v440_v27 = vadd.f32 %v439_v23, %v438_v19 }
  0xa2   :  { %862 = vmatprep.subr.mxu0 %v952_v1 }
  0xa3   :  { %863 = vmatpush3.msra.mxu0 %v304_v37  ;;  %v452_v29 = vsel %vm451_vm6, %v440_v27, %v433_v26 }
  0xa4   :  { %864 = vmatprep.subr.mxu0 %v952_v1 }
  0xa5   :  { %865 = vmatpush3.msra.mxu0 %v303_v38 }
  0xa6   :  { %866 = vmatprep.subr.mxu0 %v952_v1 }
  0xa7   :  { %867 = vmatpush3.msra.mxu0 %v302_v39 }
  0xa8   :  { %868 = vmatprep.subr.mxu0 %v952_v1 }
  0xa9   :  { %869 = vmatpush3.msra.mxu0 %v301_v40 }
  0xaa   :  { %870 = vmatprep.subr.mxu0 %v952_v1 }
  0xab   :  { %871 = vmatpush3.msra.mxu0 %v300_v52 }
  0xac   :  { %872 = vmatprep.subr.mxu0 %v952_v1 }
  0xad   :  { %873 = vmatpush3.msra.mxu0 %v299_v54 }
  0xae   :  { %875 = vmatmul.mubr.f32.vlgmr.msra.gmra.mxu0 %v316_v56 }
 0x14e   :  { %v124_v42 = vpop.f32.mrf.mxu0 }
 0x14f   :  { %v125_v43 = vadd.f32 %v723_v41, %v124_v42 }
 0x150   :  { %v811_v44 = vpop.f32.mrf.mxu0 }
 0x151   :  { %922 = vtanh.f32 %v125_v43  ;;  %v729_v44 = vld [vmem:[#allocation2 + $0x183] ss:$0 sm:$0xff] }
 0x15e   :  { %v1030_v46 = vpop.eup %922 }
 0x15f   :  { %821 = vmatmul.mubr.msk.f32.vlgmr.msra.gmra.mxu1 %vm147_vm3, %v1030_v46 }
 0x160   :  { %824 = vmatpush3.msra.mxu1 %v141_v45  ;;  %839 = vmatprep.mubr.msk.f32.mxu1 %vm953_vm0, %v952_v1  ;;  %v609_v45 = vld [vmem:[#allocation2 + $0x178] sm:$0xff] }
 0x161   :  { %825 = vmatprep.subr.mxu1 %v952_v1 }
 0x162   :  { %826 = vmatpush3.msra.mxu1 %v140_v47 }
 0x163   :  { %827 = vmatprep.subr.mxu1 %v952_v1 }
 0x164   :  { %828 = vmatpush3.msra.mxu1 %v139_v48  ;;  %v607_v48 = vld [vmem:[#allocation2 + $0x168] sm:$0xff] }
 0x165   :  { %829 = vmatprep.subr.mxu1 %v952_v1 }
 0x166   :  { %830 = vmatpush3.msra.mxu1 %v138_v49 }
 0x167   :  { %831 = vmatprep.subr.mxu1 %v952_v1 }
 0x168   :  { %832 = vmatpush3.msra.mxu1 %v137_v50  ;;  %v606_v50 = vld [vmem:[#allocation2 + $0x160] sm:$0xff] }
 0x169   :  { %833 = vmatprep.subr.mxu1 %v952_v1 }
 0x16a   :  { %834 = vmatpush3.msra.mxu1 %v136_v51 }
 0x16b   :  { %835 = vmatprep.subr.mxu1 %v952_v1 }
 0x16c   :  { %836 = vmatpush3.msra.mxu1 %v135_v53 }
 0x16d   :  { %837 = vmatprep.subr.mxu1 %v952_v1 }
 0x16e   :  { %838 = vmatpush3.msra.mxu1 %v134_v55  ;;  %v387_v30 = vpop.f32.mrf.mxu0 }
 0x16f   :  { %877 = vmatprep.subr.mxu1 %v952_v1  ;;  %v388_v47 = vadd.f32 %v729_v44, %v387_v30 }
 0x170   :  { %v876_v31 = vpop.f32.mrf.mxu0 }
 0x171   :  { %v612_v49 = vrot.slane %v388_v47, 6 }
 0x21f   :  { %v217_v9 = vpop.f32.mrf.mxu1 }
 0x220   :  { %v218_v10 = vadd.f32 %v725_v6, %v217_v9 }
 0x221   :  { %v822_v11 = vpop.f32.mrf.mxu1 }
 0x222   :  { %v221_v12 = vmax.f32 %v218_v10, 0.0 }
 0x224   :  { %840 = vmatmul.mubr.msk.f32.vlgmr.msra.gmra.mxu1 %vm54_vm1, %v221_v12 }
 0x225   :  { %878 = vmatpush3.msra.mxu1 %v448_v13  ;;  %893 = vmatprep.mubr.msk.f32.mxu1 %vm953_vm0, %v952_v1 }
 0x226   :  { %879 = vmatprep.subr.mxu1 %v952_v1 }
 0x227   :  { %880 = vmatpush3.msra.mxu1 %v447_v16 }
 0x228   :  { %881 = vmatprep.subr.mxu1 %v952_v1 }
 0x229   :  { %882 = vmatpush3.msra.mxu1 %v446_v17 }
 0x22a   :  { %883 = vmatprep.subr.mxu1 %v952_v1 }
 0x22b   :  { %884 = vmatpush3.msra.mxu1 %v445_v20 }
 0x22c   :  { %885 = vmatprep.subr.mxu1 %v952_v1 }
 0x22d   :  { %886 = vmatpush3.msra.mxu1 %v444_v21 }
 0x22e   :  { %887 = vmatprep.subr.mxu1 %v952_v1 }
 0x22f   :  { %888 = vmatpush3.msra.mxu1 %v443_v24 }
 0x230   :  { %889 = vmatprep.subr.mxu1 %v952_v1 }
 0x231   :  { %890 = vmatpush3.msra.mxu1 %v442_v25 }
 0x232   :  { %891 = vmatprep.subr.mxu1 %v952_v1 }
 0x233   :  { %892 = vmatpush3.msra.mxu1 %v441_v28 }
 0x234   :  { %894 = vmatmul.mubr.msk.f32.vlgmr.msra.gmra.mxu1 %vm54_vm1, %v452_v29  ;;  %896 = vmatprep.subr.mxu1 %v952_v1 }
 0x235   :  { %898 = vmatprep.mubr.msk.f32.mxu1 %vm953_vm0, %v952_v1 }
 0x2e4   :  { %v295_v33 = vpop.f32.mrf.mxu1 }
 0x2e5   :  { %v296_v34 = vadd.f32 %v727_v32, %v295_v33 }
 0x2e6   :  { %v841_v35 = vpop.f32.mrf.mxu1 }
 0x2e7   :  { %696 = vrot.lane.b32.xlu0 %v296_v34, %s954_s2  ;;  %v615_v51 = vsel %vm614_vm8, %v296_v34, %v612_v49 }
 0x2eb   :  { %699 = vrot.lane.b32.xlu0 %v1030_v46, %s955_s25  ;;  %v608_v46 = vld [vmem:[#allocation2 + $0x170] sm:$0xff] }
 0x2f4   :  { %v521_v36 = vpop.f32.mrf.mxu1 }
 0x2f5   :  { %v525_v37 = vmul.f32 %v521_v36, %v521_v36 }
 0x2f6   :  { %v895_v38 = vpop.f32.mrf.mxu1 }
 0x2f7   :  { %v527_v39 = vsel %vm526_vm7, %v525_v37, 0.0 }
 0x2f8   :  { %528 = vadd.xlane.f32.xlu1 %v527_v39 }
 0x359   :  { %v697_v57 = vpop.permute.xlu0 %696 }
 0x35d   :  { %v700_v59 = vpop.permute.xlu0 %699 }
 0x381   :  { %v529_v40 = vpop.xlane.xlu1 %528 }
 0x382   :  { %v530_v41 = vmax.f32 %v529_v40, 1e-24 }
 0x384   :  { %924 = vrsqrt.f32 %v530_v41 }
 0x391   :  { %v925_v42 = vpop.eup %924 }
 0x392   :  { %v532_v43 = vmul.f32 %v925_v42, %v521_v36 }
 0x394   :  { %897 = vmatpush3.xpose.msk.msra.mxu1 %vm147_vm3, %v532_v43 }
 0x395   :  { %901 = vmatprep.subr.mxu1 %v952_v1 }
 0x397   :  { %899 = vmatmul.mubr.msk.f32.vlgmr.msra.gmra.mxu1 %vm147_vm3, %v532_v43 }
 0x398   :  { %902 = vmatpush3.msra.mxu1 %v609_v45  ;;  %909 = vmatprep.mubr.msk.f32.mxu1 %vm953_vm0, %v952_v1 }
 0x399   :  { %903 = vmatprep.subr.mxu1 %v952_v1 }
 0x39a   :  { %904 = vmatpush3.msra.mxu1 %v608_v46 }
 0x39b   :  { %905 = vmatprep.subr.mxu1 %v952_v1 }
 0x39c   :  { %906 = vmatpush3.msra.mxu1 %v607_v48 }
 0x39d   :  { %907 = vmatprep.subr.mxu1 %v952_v1  ;;  %v706_v1 = vsel %vm147_vm3, %v388_v47, %v697_v57 }
 0x39e   :  { %908 = vmatpush3.msra.mxu1 %v606_v50  ;;  %v707_v61 = vsel %vm54_vm1, %v706_v1, %v700_v59 }
 0x39f   :  { %910 = vmatmul.mubr.msk.f32.vlgmr.msra.gmra.mxu1 %vm147_vm3, %v615_v51 }
 0x457   :  { %v602_v52 = vpop.f32.mrf.mxu1 }
 0x458   :  { %v694_v53 = vsel %vm693_vm9, %v602_v52, 0.0 }
 0x459   :  { %703 = vrot.lane.b32.xlu0 %v694_v53, %s956_s26  ;;  %v900_v54 = vpop.f32.mrf.mxu1 }
 0x45f   :  { %v689_v55 = vpop.f32.mrf.mxu1 }
 0x460   :  { %v690_v60 = vadd.f32 %v735_v58, %v689_v55 }
 0x461   :  { %v911_v56 = vpop.f32.mrf.mxu1 }
 0x462   :  { %v711_v62 = vrot.slane %v690_v60, 6 }
 0x4cb   :  { %v704_v63 = vpop.permute.xlu0 %703 }
 0x4cc   :  { %v709_v0 = vsel %vm708_vm10, %v707_v61, %v704_v63 }
 0x4cd   :  { %v713_v2 = vsel %vm614_vm8, %v709_v0, %v711_v62 }
 0x4ce   :  { %v715_v3 = vsel %vm714_vm11, %v713_v2, 0.0 }
 0x4cf   :  { %716 = vst [vmem:[%s1089_s4] sm:$0xff] %v715_v3 }
 0x4d0   :  { %721 = vsyncpa [#allocation3], 1 }

</bundles_post_ra>
